<compile_context>
chip_gen: v7x
topology: tpu7x:2x2x1
jax: 0.10.0
libtpu: 0.0.40
codegen_flags: <defaults>
</compile_context>

<pallas_src>
import math
from functools import partial

import jax
import jax.numpy as jnp
from jax import lax
from jax.experimental import pallas as pl
from jax.experimental.pallas import tpu as pltpu


def _round_up(x, m):
    return (x + m - 1) // m * m


def _tpu_generation():
    try:
        kind = jax.devices()[0].device_kind.lower()
    except Exception:
        return "unknown"
    if "v5" in kind:
        return "v5"
    if "v6" in kind:
        return "v6"
    if "v7" in kind:
        return "v7"
    return "unknown"


def _chip_config():
    """Per-generation tile sizes / feature alignment / VMEM budget."""
    gen = _tpu_generation()
    if gen == "v5":
        # 128 MiB VMEM, 4x 128x128 MXU, ~0.82 TB/s HBM -> tm ~ 240 already at roofline.
        return dict(gen=gen, align=128, tm=512, th=512, vmem_limit=100 << 20)
    if gen == "v6":
        # 128 MiB VMEM, 2x 256x256 MXU, ~1.3 TB/s HBM -> need tm >~ 700 for MXU-bound.
        return dict(gen=gen, align=256, tm=1024, th=512, vmem_limit=100 << 20)
    # v7x (and unknown -> conservative): 64 MiB VMEM per TC, 2 TCs, 2x 256x256 MXU.
    return dict(gen=gen, align=256, tm=512, th=256, vmem_limit=56 << 20)


def _pick_chunk(hid_p, th_max, align):
    """Largest multiple of `align` that divides hid_p and is <= th_max."""
    if hid_p <= th_max:
        return hid_p
    best = align
    c = align
    while c <= th_max:
        if hid_p % c == 0:
            best = c
        c += align
    return best


def _vmem_estimate(tm, th, in_p, out_p, w_isz, x_isz):
    """Rough double-buffered VMEM working set of one grid step (bytes)."""
    est = 2 * (tm * in_p) * x_isz                                  # x row tile
    est += 2 * (in_p * th + th + th * out_p + out_p) * w_isz       # w1/b1/w2/b2 chunks
    est += 2 * (tm * out_p) * x_isz                                # output row tile
    est += tm * out_p * 4                                          # f32 accumulator scratch
    return est


def _mlp_kernel(x_ref, w1_ref, b1_ref, w2_ref, b2_ref, o_ref, acc_ref):
    # grid = (row_tiles, hid_chunks)
    # x_ref:  (tm, in_p)     row tile (resident across the hid axis)
    # w1_ref: (in_p, th)     fc1 weight chunk (transposed vs PyTorch: (in, hid))
    # b1_ref: (1, th)        fc1 bias chunk
    # w2_ref: (th, out_p)    fc2 weight chunk (transposed vs PyTorch: (hid, out))
    # b2_ref: (1, out_p)     fc2 bias
    # o_ref:  (tm, out_p)    output row tile (resident across the hid axis)
    # acc_ref:(tm, out_p)    f32 accumulator scratch
    k = pl.program_id(1)

    @pl.when(k == 0)
    def _():
        acc_ref[...] = jnp.zeros_like(acc_ref)

    # fc1 partial: native-dtype operands on the MXU, f32 accumulation.
    h = jnp.dot(x_ref[...], w1_ref[...], preferred_element_type=jnp.float32)
    h = h + b1_ref[...].astype(jnp.float32)

    # exact GELU (erf formulation; matches torch.nn.GELU default), in f32.
    h = 0.5 * h * (1.0 + lax.erf(h * (1.0 / math.sqrt(2.0))))

    # dropout(p=0.0) == identity

    # fc2 partial contribution of this hid chunk, accumulated in f32.
    acc_ref[...] += jnp.dot(h.astype(w2_ref.dtype), w2_ref[...],
                            preferred_element_type=jnp.float32)

    @pl.when(k == pl.num_programs(1) - 1)
    def _():
        o_ref[...] = (acc_ref[...] + b2_ref[...].astype(jnp.float32)).astype(o_ref.dtype)


def pad_mlp_params(w1, b1, w2, b2, *, align=None):
    """Zero-pad weights/biases to MXU-aligned shapes ONCE (hoists per-call padding).

    Zero padding is exact: padded in rows / hid lanes / out cols contribute 0.
    """
    if align is None:
        align = _chip_config()["align"]
    in_f, hid = w1.shape
    out_f = w2.shape[1]
    in_p, hid_p, out_p = (_round_up(d, align) for d in (in_f, hid, out_f))
    w1p = jnp.pad(w1, ((0, in_p - in_f), (0, hid_p - hid)))
    b1p = jnp.pad(b1, (0, hid_p - hid))
    w2p = jnp.pad(w2, ((0, hid_p - hid), (0, out_p - out_f)))
    b2p = jnp.pad(b2, (0, out_p - out_f))
    return w1p, b1p, w2p, b2p


@partial(jax.jit, static_argnames=("out_features", "tm", "th"))
def mlp_pallas(x, w1, b1, w2, b2, *, out_features=None, tm=None, th=None):
    """x: (..., in_features). w1: (in, hid), b1: (hid,), w2: (hid, out), b2: (out,).

    Weights are stored transposed vs PyTorch so the kernel performs plain row-major
    matmuls on the MXU. Weights may be pre-padded via pad_mlp_params(); pass
    out_features to slice padded output columns off. Params should be stored in the
    compute dtype (e.g. bf16) for best MXU throughput; f32 operands take the slower
    multi-pass MXU path.
    """
    cfg = _chip_config()
    align = cfg["align"]
    tm_target = tm if tm is not None else cfg["tm"]
    th_target = th if th is not None else cfg["th"]

    in_w, hid_w = w1.shape
    out_w = w2.shape[1]
    out_f = out_features if out_features is not None else out_w
    in_f = x.shape[-1]
    lead = x.shape[:-1]

    x2 = x.reshape(-1, in_f)
    m = x2.shape[0]

    # MXU-aligned padded feature dims. If the weights were pre-padded these pads
    # are zero-width no-ops folded away by XLA.
    in_p = _round_up(max(in_f, in_w), align)
    hid_p = _round_up(hid_w, align)
    out_p = _round_up(out_w, align)

    # Hidden-dim chunk: largest align-multiple divisor of hid_p that is <= target.
    th_eff = _pick_chunk(hid_p, max(th_target, align), align)

    # Row tile (128-aligned; capped by the padded problem size).
    tm_eff = min(_round_up(tm_target, 128), _round_up(m, 128))

    # v7x megacore: keep >= 2 row tiles so both TensorCores get parallel work.
    if cfg["gen"] == "v7" and m > 128:
        tm_eff = min(tm_eff, _round_up((m + 1) // 2, 128))

    # Shrink tiles until the double-buffered working set fits the VMEM budget.
    x_isz = jnp.dtype(x.dtype).itemsize
    w_isz = jnp.dtype(w1.dtype).itemsize
    budget = int(cfg["vmem_limit"] * 0.9)
    while (_vmem_estimate(tm_eff, th_eff, in_p, out_p, w_isz, x_isz) > budget
           and tm_eff > 128):
        tm_eff = max(128, tm_eff // 2)
    while (_vmem_estimate(tm_eff, th_eff, in_p, out_p, w_isz, x_isz) > budget
           and th_eff > align):
        th_eff = _pick_chunk(hid_p, max(align, th_eff // 2), align)

    m_p = _round_up(m, tm_eff)

    # Zero padding is exact: padded x cols / w1 rows contribute 0 to fc1, padded hid
    # lanes give GELU(0) == 0 against zero w2 rows, padded rows / out cols are sliced.
    x_pad = jnp.pad(x2, ((0, m_p - m), (0, in_p - in_f)))
    w1_pad = jnp.pad(w1, ((0, in_p - in_w), (0, hid_p - hid_w)))
    b1_pad = jnp.pad(b1, (0, hid_p - hid_w)).reshape(1, hid_p)
    w2_pad = jnp.pad(w2, ((0, hid_p - hid_w), (0, out_p - out_w)))
    b2_pad = jnp.pad(b2, (0, out_p - out_w)).reshape(1, out_p)

    grid = (m_p // tm_eff, hid_p // th_eff)
    n_row_tiles = grid[0]

    # Weights are re-streamed once per row tile; count that in the estimate.
    cost = pl.CostEstimate(
        flops=2 * m_p * in_p * hid_p + 2 * m_p * hid_p * out_p,
        transcendentals=m_p * hid_p,
        bytes_accessed=int(
            m_p * in_p * x_isz
            + n_row_tiles * (in_p * hid_p + hid_p * out_p + hid_p + out_p) * w_isz
            + m_p * out_p * x_isz),
    )

    out = pl.pallas_call(
        _mlp_kernel,
        out_shape=jax.ShapeDtypeStruct((m_p, out_p), x.dtype),
        grid_spec=pltpu.PrefetchScalarGridSpec(
            num_scalar_prefetch=0,
            grid=grid,
            in_specs=[
                pl.BlockSpec((tm_eff, in_p), lambda i, k: (i, 0)),   # x row tile (resident over k)
                pl.BlockSpec((in_p, th_eff), lambda i, k: (0, k)),   # w1 hid-chunk
                pl.BlockSpec((1, th_eff), lambda i, k: (0, k)),      # b1 hid-chunk
                pl.BlockSpec((th_eff, out_p), lambda i, k: (k, 0)),  # w2 hid-chunk
                pl.BlockSpec((1, out_p), lambda i, k: (0, 0)),       # b2
            ],
            out_specs=pl.BlockSpec((tm_eff, out_p), lambda i, k: (i, 0)),
            scratch_shapes=[pltpu.VMEM((tm_eff, out_p), jnp.float32)],
        ),
        compiler_params=pltpu.CompilerParams(
            dimension_semantics=("parallel", "arbitrary"),
            vmem_limit_bytes=cfg["vmem_limit"],
        ),
        cost_estimate=cost,
    )(x_pad, w1_pad, b1_pad, w2_pad, b2_pad)

    return out[:m, :out_f].reshape(*lead, out_f)


def init_mlp_params(key, in_features, hidden_features, out_features, dtype=jnp.float32):
    """Deterministic init mirroring nn.Linear's U(-1/sqrt(fan_in), 1/sqrt(fan_in))."""
    k1, k2, k3, k4 = jax.random.split(key, 4)
    lim1 = 1.0 / math.sqrt(in_features)
    lim2 = 1.0 / math.sqrt(hidden_features)
    # Stored transposed vs PyTorch: (in, out) so the kernel does x @ W.
    w1 = jax.random.uniform(k1, (in_features, hidden_features), dtype, -lim1, lim1)
    b1 = jax.random.uniform(k2, (hidden_features,), dtype, -lim1, lim1)
    w2 = jax.random.uniform(k3, (hidden_features, out_features), dtype, -lim2, lim2)
    b2 = jax.random.uniform(k4, (out_features,), dtype, -lim2, lim2)
    return w1, b1, w2, b2


def mlp_reference(x, w1, b1, w2, b2):
    h = x.astype(jnp.float32) @ w1.astype(jnp.float32) + b1.astype(jnp.float32)
    h = 0.5 * h * (1.0 + lax.erf(h / math.sqrt(2.0)))
    return (h @ w2.astype(jnp.float32) + b2.astype(jnp.float32)).astype(x.dtype)


if __name__ == "__main__":
    batch, seq = 2, 8
    in_features, hidden_features, out_features = 32, 64, 32

    key = jax.random.PRNGKey(0)
    kx, kp = jax.random.split(key)
    x = jax.random.normal(kx, (batch, seq, in_features), jnp.float32)
    w1, b1, w2, b2 = init_mlp_params(kp, in_features, hidden_features, out_features)

    # Hoist weight padding out of the per-call path: pad once at "init" time.
    pw1, pb1, pw2, pb2 = pad_mlp_params(w1, b1, w2, b2)

    # f32 path (exact vs reference).
    out = mlp_pallas(x, pw1, pb1, pw2, pb2, out_features=out_features)
    out = jax.block_until_ready(out)

    ref = mlp_reference(x, w1, b1, w2, b2)
    assert out.shape == (batch, seq, out_features)
    assert jnp.allclose(out, ref, atol=1e-5, rtol=1e-5), "f32 mismatch vs reference"

    # bf16 path (params stored in bf16 -> native MXU dtype, f32 accumulation).
    xb = x.astype(jnp.bfloat16)
    bw1, bb1, bw2, bb2 = (p.astype(jnp.bfloat16) for p in (pw1, pb1, pw2, pb2))
    out_bf16 = mlp_pallas(xb, bw1, bb1, bw2, bb2, out_features=out_features)
    out_bf16 = jax.block_until_ready(out_bf16)
    assert out_bf16.shape == (batch, seq, out_features)
    # bf16 operands lose precision vs the all-f32 reference -> loose tolerance.
    assert jnp.allclose(out_bf16.astype(jnp.float32), ref, atol=1e-1, rtol=1e-1), \
        "bf16 mismatch vs reference"

    print("KERNEL_OK")
</pallas_src>

<mosaic_0001>
module attributes {stable_mosaic.version = 11 : i64} {
  func.func @_mlp_kernel(%arg0: i32, %arg1: i32, %arg2: memref<128x256xf32, #tpu.memory_space<vmem>>, %arg3: memref<256x256xf32, #tpu.memory_space<vmem>>, %arg4: memref<1x256xf32, #tpu.memory_space<vmem>>, %arg5: memref<256x256xf32, #tpu.memory_space<vmem>>, %arg6: memref<1x256xf32, #tpu.memory_space<vmem>>, %arg7: memref<128x256xf32, #tpu.memory_space<vmem>>, %arg8: memref<128x256xf32, #tpu.memory_space<vmem>>) attributes {dimension_semantics = [#tpu.dimension_semantics<parallel>, #tpu.dimension_semantics<arbitrary>], iteration_bounds = array<i64: 1, 1>, scalar_prefetch = 0 : i64, scratch_operands = 1 : i64, tpu.core_type = #tpu.core_type<tc>, window_params = [{transform_indices = @transform_0, window_bounds = array<i64: 128, 256>}, {transform_indices = @transform_1, window_bounds = array<i64: 256, 256>}, {transform_indices = @transform_2, window_bounds = array<i64: 1, 256>}, {transform_indices = @transform_3, window_bounds = array<i64: 256, 256>}, {pipeline_mode = #tpu.pipeline_mode<synchronous>, transform_indices = @transform_4, window_bounds = array<i64: 1, 256>}, {transform_indices = @transform_5, window_bounds = array<i64: 128, 256>}]} {
    %c0_i32 = arith.constant 0 : i32
    %0 = arith.cmpi eq, %arg1, %c0_i32 : i32
    %1 = arith.extui %0 : i1 to i32
    %c0_i32_0 = arith.constant 0 : i32
    %2 = arith.cmpi ne, %1, %c0_i32_0 : i32
    scf.if %2 {
      %cst_18 = arith.constant 0.000000e+00 : f32
      %25 = vector.broadcast %cst_18 : f32 to vector<128x256xf32>
      %c0_19 = arith.constant 0 : index
      %c0_20 = arith.constant 0 : index
      %26 = vector.load %arg8[%c0_19, %c0_20] : memref<128x256xf32, #tpu.memory_space<vmem>>, vector<128x256xf32>
      tpu.vector_store %arg8[%c0_19, %c0_20], %25 {strides = array<i32>} : memref<128x256xf32, #tpu.memory_space<vmem>>, vector<128x256xf32>,
    } else {
    }
    %c0 = arith.constant 0 : index
    %c0_1 = arith.constant 0 : index
    %3 = vector.load %arg2[%c0, %c0_1] : memref<128x256xf32, #tpu.memory_space<vmem>>, vector<128x256xf32>
    %c0_2 = arith.constant 0 : index
    %c0_3 = arith.constant 0 : index
    %4 = vector.load %arg3[%c0_2, %c0_3] : memref<256x256xf32, #tpu.memory_space<vmem>>, vector<256x256xf32>
    %cst = arith.constant dense<0.000000e+00> : vector<128x256xf32>
    %5 = tpu.matmul %3, %4, %cst {dimension_numbers = #tpu.dot_dimension_numbers<[1], [0], [0], [1], [0, 0, 1, 1], [], []>} : vector<128x256xf32>, vector<256x256xf32>, vector<128x256xf32> -> vector<128x256xf32>
    %c0_4 = arith.constant 0 : index
    %c0_5 = arith.constant 0 : index
    %6 = vector.load %arg4[%c0_4, %c0_5] : memref<1x256xf32, #tpu.memory_space<vmem>>, vector<1x256xf32>
    %7 = vector.broadcast %6 : vector<1x256xf32> to vector<128x256xf32>
    %8 = arith.addf %5, %7 : vector<128x256xf32>
    %cst_6 = arith.constant 5.000000e-01 : f32
    %9 = vector.broadcast %cst_6 : f32 to vector<128x256xf32>
    %10 = arith.mulf %9, %8 : vector<128x256xf32>
    %cst_7 = arith.constant 0.707106769 : f32
    %11 = vector.broadcast %cst_7 : f32 to vector<128x256xf32>
    %12 = arith.mulf %8, %11 : vector<128x256xf32>
    %13 = math.erf %12 : vector<128x256xf32>
    %cst_8 = arith.constant 1.000000e+00 : f32
    %14 = vector.broadcast %cst_8 : f32 to vector<128x256xf32>
    %15 = arith.addf %14, %13 : vector<128x256xf32>
    %16 = arith.mulf %10, %15 : vector<128x256xf32>
    %c0_9 = arith.constant 0 : index
    %c0_10 = arith.constant 0 : index
    %17 = vector.load %arg8[%c0_9, %c0_10] : memref<128x256xf32, #tpu.memory_space<vmem>>, vector<128x256xf32>
    %c0_11 = arith.constant 0 : index
    %c0_12 = arith.constant 0 : index
    %18 = vector.load %arg5[%c0_11, %c0_12] : memref<256x256xf32, #tpu.memory_space<vmem>>, vector<256x256xf32>
    %cst_13 = arith.constant dense<0.000000e+00> : vector<128x256xf32>
    %19 = tpu.matmul %16, %18, %cst_13 {dimension_numbers = #tpu.dot_dimension_numbers<[1], [0], [0], [1], [0, 0, 1, 1], [], []>} : vector<128x256xf32>, vector<256x256xf32>, vector<128x256xf32> -> vector<128x256xf32>
    %20 = arith.addf %17, %19 : vector<128x256xf32>
    %c0_14 = arith.constant 0 : index
    %c0_15 = arith.constant 0 : index
    %21 = vector.load %arg8[%c0_14, %c0_15] : memref<128x256xf32, #tpu.memory_space<vmem>>, vector<128x256xf32>
    tpu.vector_store %arg8[%c0_14, %c0_15], %20 {strides = array<i32>} : memref<128x256xf32, #tpu.memory_space<vmem>>, vector<128x256xf32>,
    %c0_i32_16 = arith.constant 0 : i32
    %22 = arith.cmpi eq, %arg1, %c0_i32_16 : i32
    %23 = arith.extui %22 : i1 to i32
    %c0_i32_17 = arith.constant 0 : i32
    %24 = arith.cmpi ne, %23, %c0_i32_17 : i32
    scf.if %24 {
      %c0_18 = arith.constant 0 : index
      %c0_19 = arith.constant 0 : index
      %25 = vector.load %arg8[%c0_18, %c0_19] : memref<128x256xf32, #tpu.memory_space<vmem>>, vector<128x256xf32>
      %c0_20 = arith.constant 0 : index
      %c0_21 = arith.constant 0 : index
      %26 = vector.load %arg6[%c0_20, %c0_21] : memref<1x256xf32, #tpu.memory_space<vmem>>, vector<1x256xf32>
      %27 = vector.broadcast %26 : vector<1x256xf32> to vector<128x256xf32>
      %28 = arith.addf %25, %27 : vector<128x256xf32>
      %c0_22 = arith.constant 0 : index
      %c0_23 = arith.constant 0 : index
      %29 = vector.load %arg7[%c0_22, %c0_23] : memref<128x256xf32, #tpu.memory_space<vmem>>, vector<128x256xf32>
      tpu.vector_store %arg7[%c0_22, %c0_23], %28 {strides = array<i32>} : memref<128x256xf32, #tpu.memory_space<vmem>>, vector<128x256xf32>,
    } else {
    }
    return
  }
  func.func @transform_0(%arg0: i32, %arg1: i32) -> (i32, i32) {
    %c0_i32 = arith.constant 0 : i32
    %c0_i32_0 = arith.constant 0 : i32
    return %arg0, %c0_i32 : i32, i32
  }
  func.func @transform_1(%arg0: i32, %arg1: i32) -> (i32, i32) {
    %c0_i32 = arith.constant 0 : i32
    %c0_i32_0 = arith.constant 0 : i32
    return %c0_i32, %arg1 : i32, i32
  }
  func.func @transform_2(%arg0: i32, %arg1: i32) -> (i32, i32) {
    %c0_i32 = arith.constant 0 : i32
    %c0_i32_0 = arith.constant 0 : i32
    return %c0_i32, %arg1 : i32, i32
  }
  func.func @transform_3(%arg0: i32, %arg1: i32) -> (i32, i32) {
    %c0_i32 = arith.constant 0 : i32
    %c0_i32_0 = arith.constant 0 : i32
    return %arg1, %c0_i32 : i32, i32
  }
  func.func @transform_4(%arg0: i32, %arg1: i32) -> (i32, i32) {
    %c0_i32 = arith.constant 0 : i32
    %c0_i32_0 = arith.constant 0 : i32
    %c0_i32_1 = arith.constant 0 : i32
    return %c0_i32, %c0_i32_0 : i32, i32
  }
  func.func @transform_5(%arg0: i32, %arg1: i32) -> (i32, i32) {
    %c0_i32 = arith.constant 0 : i32
    %c0_i32_0 = arith.constant 0 : i32
    return %arg0, %c0_i32 : i32, i32
  }
}

</mosaic_0001>

<bundles_post_ra>
// kernel: mlp_pallas.1
= control target key start
LH: loop header
LB: loop body
LE: loop exit
PB: predicated region body
PF: predicated region fallthrough
CT: control target
= control target key end

     0   :  { %10 = vsyncpa [#allocation4], 0  ;;  %s1615_s0 = inlined_call_operand.vmem [shape: f32[128,256], index: 0, kind: input, shape index: {}]   ;;  %s1616_s1 = inlined_call_operand.hbm [shape: f32[256,256], index: 1, kind: input, shape index: {}]   ;;  %s1617_s2 = inlined_call_operand.vmem [shape: f32[1,256], index: 2, kind: input, shape index: {}]   ;;  %s1618_s3 = inlined_call_operand.hbm [shape: f32[256,256], index: 3, kind: input, shape index: {}]   ;;  %s1619_s4 = inlined_call_operand.vmem [shape: f32[1,256], index: 4, kind: input, shape index: {}]   ;;  %s1620_s5 = inlined_call_operand.vmem [shape: f32[128,256], index: 5, kind: output, shape index: {}]  }
   0x1   :  { %11 = vsyncpa [#allocation6], 0  ;;  %s1195_s18 = smov [#allocation3]   ;;  %s1147_s22 = scalar_lea.hbm %s1616_s1, 8192 }
   0x2   :  { %s19_s19 = sshll.u32 %s1195_s18, 4  ;;  %p1148_p0 = scmp.ne.s32.totalorder %s1616_s1, %s1147_s22  ;;  %s20_s19 = int_to_ptr.vmem [resolvable:$true] %s19_s19 }
   0x3   :  { %p1151_p1 = scmp.lt.u32.totalorder %s1147_s22, %s1616_s1 }
   0x5   :  { %p1153_p2 = pnand %p1151_p1, %p1148_p0 }
   0x7   :  { %1156 = shalt.err (!%p1153_p2)
}
   0x8   :  { %s1157_s27 = scalar_lea.vmem %s20_s19, 8192  ;;  %p1162_p4 = scmp.lt.s32.totalorder %s20_s19, %s20_s19 }
   0x9   :  { %p1158_p3 = scmp.ne.s32.totalorder %s20_s19, %s1157_s27  ;;  %p1163_p5 = scmp.lt.s32.totalorder %s1157_s27, %s1157_s27 }
   0xb   :  { %p1164_p6 = por %p1163_p5, %p1162_p4 }
   0xd   :  { %p1165_p7 = pnand %p1164_p6, %p1158_p3 }
   0xf   :  { %1168 = shalt.err (!%p1165_p7)
}
  0x10   :  { %s1196_s28 = smov 256   ;;  %s1197_s29 = smov 16  }
  0x11   :  { %25 = dma.hbm_to_vmem [thread:$0]  %s1616_s1, 8192, %s20_s19, [#allocation4], %s1196_s28, %s1196_s28, %s1197_s29  }
  0x12   :  { %s1198_s7 = smov [#allocation5]   ;;  %s1169_s11 = scalar_lea.hbm %s1618_s3, 8192 }
  0x13   :  { %s33_s8 = sshll.u32 %s1198_s7, 4  ;;  %p1170_p8 = scmp.ne.s32.totalorder %s1618_s3, %s1169_s11  ;;  %s34_s8 = int_to_ptr.vmem [resolvable:$true] %s33_s8 }
  0x14   :  { %p1173_p9 = scmp.lt.u32.totalorder %s1169_s11, %s1618_s3 }
  0x16   :  { %p1175_p10 = pnand %p1173_p9, %p1170_p8 }
  0x18   :  { %1178 = shalt.err (!%p1175_p10)
}
  0x19   :  { %s1179_s16 = scalar_lea.vmem %s34_s8, 8192  ;;  %p1184_p12 = scmp.lt.s32.totalorder %s34_s8, %s34_s8 }
  0x1a   :  { %p1180_p11 = scmp.ne.s32.totalorder %s34_s8, %s1179_s16  ;;  %p1185_p13 = scmp.lt.s32.totalorder %s1179_s16, %s1179_s16 }
  0x1c   :  { %p1186_p0 = por %p1185_p13, %p1184_p12 }
  0x1e   :  { %p1187_p1 = pnand %p1186_p0, %p1180_p11 }
  0x20   :  { %1190 = shalt.err (!%p1187_p1)
}
  0x21   :  { %39 = dma.hbm_to_vmem [thread:$0]  %s1618_s3, 8192, %s34_s8, [#allocation6], %s1196_s28, %s1196_s28, %s1197_s29  }
  0x22   :  { %1191 = dma.done.wait [#allocation4], 8192  }
  0x23   :  { %1192 = vsyncadd [#allocation4], 4294959104 }
  0x24   :  { %1193 = dma.done.wait [#allocation6], 8192  }
  0x25   :  { %1194 = vsyncadd [#allocation6], 4294959104  ;;  %v117_v0 = vld [vmem:[#allocation3 + $0x8] sm:$0xff]  ;;  %v119_v1 = vld [vmem:[#allocation3 + $0x18] sm:$0xff] }
  0x26   :  { %v116_v2 = vld [vmem:[#allocation3] sm:$0xff]  ;;  %v951_v3 = vpack.c.bf16 %v119_v1, %v117_v0  ;;  %v118_v4 = vld [vmem:[#allocation3 + $0x10] sm:$0xff]  ;;  %v121_v5 = vld [vmem:[#allocation3 + $0x28] sm:$0xff] }
  0x27   :  { %v123_v6 = vld [vmem:[#allocation3 + $0x38] sm:$0xff]  ;;  %v953_v7 = vpack.c.bf16 %v118_v4, %v116_v2  ;;  %v120_v9 = vld [vmem:[#allocation3 + $0x20] sm:$0xff]  ;;  %v122_v10 = vld [vmem:[#allocation3 + $0x30] sm:$0xff] }
  0x28   :  { %v955_v8 = vpack.c.bf16 %v123_v6, %v121_v5  ;;  %v125_v11 = vld [vmem:[#allocation3 + $0x48] sm:$0xff]  ;;  %952 = vmatprep.subr.bf16.mxu0 %v951_v3  ;;  %v127_v12 = vld [vmem:[#allocation3 + $0x58] sm:$0xff]  ;;  %v957_v13 = vpack.c.bf16 %v122_v10, %v120_v9  ;;  %v124_v15 = vld [vmem:[#allocation3 + $0x40] sm:$0xff] }
  0x29   :  { %954 = vmatpush1.bf16.msra.mxu0 %v953_v7  ;;  %v959_v14 = vpack.c.bf16 %v127_v12, %v125_v11  ;;  %v126_v16 = vld [vmem:[#allocation3 + $0x50] sm:$0xff]  ;;  %v129_v17 = vld [vmem:[#allocation3 + $0x68] sm:$0xff]  ;;  %v131_v18 = vld [vmem:[#allocation3 + $0x78] sm:$0xff] }
  0x2a   :  { %956 = vmatprep.subr.bf16.mxu0 %v955_v8  ;;  %v961_v19 = vpack.c.bf16 %v126_v16, %v124_v15  ;;  %v963_v20 = vpack.c.bf16 %v131_v18, %v129_v17  ;;  %v128_v21 = vld [vmem:[#allocation3 + $0x60] sm:$0xff]  ;;  %v130_v22 = vld [vmem:[#allocation3 + $0x70] sm:$0xff]  ;;  %v133_v23 = vld [vmem:[#allocation3 + $0x88] sm:$0xff] }
  0x2b   :  { %v135_v24 = vld [vmem:[#allocation3 + $0x98] sm:$0xff]  ;;  %v965_v25 = vpack.c.bf16 %v130_v22, %v128_v21  ;;  %v132_v27 = vld [vmem:[#allocation3 + $0x80] sm:$0xff]  ;;  %v134_v28 = vld [vmem:[#allocation3 + $0x90] sm:$0xff] }
  0x2c   :  { %v967_v26 = vpack.c.bf16 %v135_v24, %v133_v23  ;;  %v137_v29 = vld [vmem:[#allocation3 + $0xa8] sm:$0xff]  ;;  %v139_v30 = vld [vmem:[#allocation3 + $0xb8] sm:$0xff]  ;;  %v969_v31 = vpack.c.bf16 %v134_v28, %v132_v27  ;;  %v136_v33 = vld [vmem:[#allocation3 + $0xa0] sm:$0xff] }
  0x2d   :  { %958 = vmatpush1.bf16.msra.mxu0 %v957_v13  ;;  %v971_v32 = vpack.c.bf16 %v139_v30, %v137_v29  ;;  %v138_v34 = vld [vmem:[#allocation3 + $0xb0] sm:$0xff]  ;;  %v141_v35 = vld [vmem:[#allocation3 + $0xc8] sm:$0xff]  ;;  %v143_v36 = vld [vmem:[#allocation3 + $0xd8] sm:$0xff] }
  0x2e   :  { %960 = vmatprep.subr.bf16.mxu0 %v959_v14  ;;  %v973_v37 = vpack.c.bf16 %v138_v34, %v136_v33  ;;  %v975_v38 = vpack.c.bf16 %v143_v36, %v141_v35  ;;  %v140_v39 = vld [vmem:[#allocation3 + $0xc0] sm:$0xff]  ;;  %v142_v40 = vld [vmem:[#allocation3 + $0xd0] sm:$0xff]  ;;  %v85_v41 = vld [vmem:[%s1615_s0 + $0x8] sm:$0xff] }
  0x2f   :  { %v145_v42 = vld [vmem:[#allocation3 + $0xe8] sm:$0xff]  ;;  %v147_v43 = vld [vmem:[#allocation3 + $0xf8] sm:$0xff]  ;;  %256 = vmatprep.mubr.f32.mxu0 %v85_v41  ;;  %v977_v44 = vpack.c.bf16 %v142_v40, %v140_v39  ;;  %v144_v46 = vld [vmem:[#allocation3 + $0xe0] sm:$0xff] }
  0x30   :  { %v979_v45 = vpack.c.bf16 %v147_v43, %v145_v42  ;;  %v146_v47 = vld [vmem:[#allocation3 + $0xf0] sm:$0xff]  ;;  %v149_v48 = vld [vmem:[#allocation3 + $0x108] sm:$0xff]  ;;  %v151_v49 = vld [vmem:[#allocation3 + $0x118] sm:$0xff] }
  0x31   :  { %962 = vmatpush1.bf16.msra.mxu0 %v961_v19  ;;  %v981_v50 = vpack.c.bf16 %v146_v47, %v144_v46  ;;  %v983_v51 = vpack.c.bf16 %v151_v49, %v149_v48  ;;  %v148_v52 = vld [vmem:[#allocation3 + $0x100] sm:$0xff]  ;;  %v150_v53 = vld [vmem:[#allocation3 + $0x110] sm:$0xff]  ;;  %v153_v54 = vld [vmem:[#allocation3 + $0x128] sm:$0xff] }
  0x32   :  { %964 = vmatprep.subr.bf16.mxu0 %v963_v20  ;;  %v155_v55 = vld [vmem:[#allocation3 + $0x138] sm:$0xff]  ;;  %v152_v56 = vld [vmem:[#allocation3 + $0x120] sm:$0xff]  ;;  %v154_v57 = vld [vmem:[#allocation3 + $0x130] sm:$0xff]  ;;  %v985_v58 = vpack.c.bf16 %v150_v53, %v148_v52 }
  0x33   :  { %v157_v59 = vld [vmem:[#allocation3 + $0x148] sm:$0xff]  ;;  %v159_v60 = vld [vmem:[#allocation3 + $0x158] sm:$0xff]  ;;  %v545_v63 = vld [vmem:[#allocation5] sm:$0xff]  ;;  %v987_v0 = vpack.c.bf16 %v155_v55, %v153_v54  ;;  %v989_v11 = vpack.c.bf16 %v154_v57, %v152_v56 }
  0x34   :  { %v546_v61 = vld [vmem:[#allocation5 + $0x8] sm:$0xff]  ;;  %v548_v62 = vld [vmem:[#allocation5 + $0x18] sm:$0xff]  ;;  %v547_v2 = vld [vmem:[#allocation5 + $0x10] sm:$0xff]  ;;  %v991_v15 = vpack.c.bf16 %v159_v60, %v157_v59 }
  0x35   :  { %966 = vmatpush1.bf16.msra.mxu0 %v965_v25  ;;  %v1015_v1 = vpack.c.bf16 %v548_v62, %v546_v61  ;;  %v550_v3 = vld [vmem:[#allocation5 + $0x28] sm:$0xff]  ;;  %v552_v4 = vld [vmem:[#allocation5 + $0x38] sm:$0xff]  ;;  %v1017_v5 = vpack.c.bf16 %v547_v2, %v545_v63  ;;  %v549_v7 = vld [vmem:[#allocation5 + $0x20] sm:$0xff] }
  0x36   :  { %968 = vmatprep.subr.bf16.mxu0 %v967_v26  ;;  %v1019_v6 = vpack.c.bf16 %v552_v4, %v550_v3  ;;  %v551_v8 = vld [vmem:[#allocation5 + $0x30] sm:$0xff]  ;;  %v554_v9 = vld [vmem:[#allocation5 + $0x48] sm:$0xff]  ;;  %v556_v10 = vld [vmem:[#allocation5 + $0x58] sm:$0xff] }
  0x37   :  { %1016 = vmatprep.subr.bf16.mxu1 %v1015_v1  ;;  %v156_v12 = vld [vmem:[#allocation3 + $0x140] sm:$0xff]  ;;  %v158_v13 = vld [vmem:[#allocation3 + $0x150] sm:$0xff]  ;;  %v1021_v14 = vpack.c.bf16 %v551_v8, %v549_v7  ;;  %v161_v16 = vld [vmem:[#allocation3 + $0x168] sm:$0xff]  ;;  %v1023_v17 = vpack.c.bf16 %v556_v10, %v554_v9 }
  0x38   :  { %1018 = vmatpush1.bf16.msra.mxu1 %v1017_v5  ;;  %v553_v18 = vld [vmem:[#allocation5 + $0x40] sm:$0xff]  ;;  %v555_v19 = vld [vmem:[#allocation5 + $0x50] sm:$0xff]  ;;  %v163_v20 = vld [vmem:[#allocation3 + $0x178] sm:$0xff]  ;;  %v993_v23 = vpack.c.bf16 %v158_v13, %v156_v12 }
  0x39   :  { %970 = vmatpush1.bf16.msra.mxu0 %v969_v31  ;;  %1020 = vmatprep.subr.bf16.mxu1 %v1019_v6  ;;  %v558_v21 = vld [vmem:[#allocation5 + $0x68] sm:$0xff]  ;;  %v560_v22 = vld [vmem:[#allocation5 + $0x78] sm:$0xff]  ;;  %v160_v24 = vld [vmem:[#allocation3 + $0x160] sm:$0xff]  ;;  %v1025_v26 = vpack.c.bf16 %v555_v19, %v553_v18  ;;  %v995_v27 = vpack.c.bf16 %v163_v20, %v161_v16 }
  0x3a   :  { %972 = vmatprep.subr.bf16.mxu0 %v971_v32  ;;  %v162_v25 = vld [vmem:[#allocation3 + $0x170] sm:$0xff]  ;;  %v165_v28 = vld [vmem:[#allocation3 + $0x188] sm:$0xff]  ;;  %v1027_v29 = vpack.c.bf16 %v560_v22, %v558_v21  ;;  %v557_v30 = vld [vmem:[#allocation5 + $0x60] sm:$0xff] }
  0x3b   :  { %v559_v31 = vld [vmem:[#allocation5 + $0x70] sm:$0xff]  ;;  %v167_v32 = vld [vmem:[#allocation3 + $0x198] sm:$0xff]  ;;  %v562_v33 = vld [vmem:[#allocation5 + $0x88] sm:$0xff]  ;;  %v997_v35 = vpack.c.bf16 %v162_v25, %v160_v24 }
  0x3c   :  { %1022 = vmatpush1.bf16.msra.mxu1 %v1021_v14  ;;  %v564_v34 = vld [vmem:[#allocation5 + $0x98] sm:$0xff]  ;;  %v164_v36 = vld [vmem:[#allocation3 + $0x180] sm:$0xff]  ;;  %v999_v39 = vpack.c.bf16 %v167_v32, %v165_v28  ;;  %v169_v40 = vld [vmem:[#allocation3 + $0x1a8] sm:$0xff] }
  0x3d   :  { %974 = vmatpush1.bf16.msra.mxu0 %v973_v37  ;;  %1024 = vmatprep.subr.bf16.mxu1 %v1023_v17  ;;  %v166_v37 = vld [vmem:[#allocation3 + $0x190] sm:$0xff]  ;;  %v1031_v41 = vpack.c.bf16 %v564_v34, %v562_v33  ;;  %v561_v42 = vld [vmem:[#allocation5 + $0x80] sm:$0xff]  ;;  %v568_v46 = vld [vmem:[#allocation5 + $0xb8] sm:$0xff] }
  0x3e   :  { %976 = vmatprep.subr.bf16.mxu0 %v975_v38  ;;  %v1029_v38 = vpack.c.bf16 %v559_v31, %v557_v30  ;;  %v563_v43 = vld [vmem:[#allocation5 + $0x90] sm:$0xff]  ;;  %v1001_v47 = vpack.c.bf16 %v166_v37, %v164_v36  ;;  %v168_v48 = vld [vmem:[#allocation3 + $0x1a0] sm:$0xff]  ;;  %v173_v52 = vld [vmem:[#allocation3 + $0x1c8] sm:$0xff] }
  0x3f   :  { %v170_v49 = vld [vmem:[#allocation3 + $0x1b0] sm:$0xff]  ;;  %v565_v54 = vld [vmem:[#allocation5 + $0xa0] sm:$0xff]  ;;  %v175_v56 = vld [vmem:[#allocation3 + $0x1d8] sm:$0xff] }
  0x40   :  { %1026 = vmatpush1.bf16.msra.mxu1 %v1025_v26  ;;  %v567_v55 = vld [vmem:[#allocation5 + $0xb0] sm:$0xff]  ;;  %v570_v57 = vld [vmem:[#allocation5 + $0xc8] sm:$0xff]  ;;  %v1005_v59 = vpack.c.bf16 %v170_v49, %v168_v48  ;;  %v172_v60 = vld [vmem:[#allocation3 + $0x1c0] sm:$0xff]  ;;  %v1007_v63 = vpack.c.bf16 %v175_v56, %v173_v52 }
  0x41   :  { %978 = vmatpush1.bf16.msra.mxu0 %v977_v44  ;;  %1028 = vmatprep.subr.bf16.mxu1 %v1027_v29  ;;  %v171_v44 = vld [vmem:[#allocation3 + $0x1b8] sm:$0xff]  ;;  %v174_v61 = vld [vmem:[#allocation3 + $0x1d0] sm:$0xff]  ;;  %v1037_v62 = vpack.c.bf16 %v567_v55, %v565_v54  ;;  %v569_v2 = vld [vmem:[#allocation5 + $0xc0] sm:$0xff] }
  0x42   :  { %980 = vmatprep.subr.bf16.mxu0 %v979_v45  ;;  %v566_v45 = vld [vmem:[#allocation5 + $0xa8] sm:$0xff]  ;;  %v571_v3 = vld [vmem:[#allocation5 + $0xd0] sm:$0xff]  ;;  %v179_v4 = vld [vmem:[#allocation3 + $0x1f8] sm:$0xff]  ;;  %v1009_v7 = vpack.c.bf16 %v174_v61, %v172_v60 }
  0x43   :  { %v1035_v53 = vpack.c.bf16 %v568_v46, %v566_v45  ;;  %v574_v5 = vld [vmem:[#allocation5 + $0xe8] sm:$0xff]  ;;  %v576_v6 = vld [vmem:[#allocation5 + $0xf8] sm:$0xff]  ;;  %v176_v8 = vld [vmem:[#allocation3 + $0x1e0] sm:$0xff]  ;;  %v1041_v9 = vpack.c.bf16 %v571_v3, %v569_v2 }
  0x44   :  { %1030 = vmatpush1.bf16.msra.mxu1 %v1029_v38  ;;  %v1043_v12 = vpack.c.bf16 %v576_v6, %v574_v5  ;;  %v573_v13 = vld [vmem:[#allocation5 + $0xe0] sm:$0xff]  ;;  %v575_v14 = vld [vmem:[#allocation5 + $0xf0] sm:$0xff]  ;;  %v580_v16 = vld [vmem:[#allocation5 + $0x118] sm:$0xff] }
  0x45   :  { %982 = vmatpush1.bf16.msra.mxu0 %v981_v50  ;;  %v1033_v50 = vpack.c.bf16 %v563_v43, %v561_v42  ;;  %1032 = vmatprep.subr.bf16.mxu1 %v1031_v41  ;;  %v1045_v18 = vpack.c.bf16 %v575_v14, %v573_v13  ;;  %v577_v20 = vld [vmem:[#allocation5 + $0x100] sm:$0xff]  ;;  %v579_v21 = vld [vmem:[#allocation5 + $0x110] sm:$0xff]  ;;  %v582_v22 = vld [vmem:[#allocation5 + $0x128] sm:$0xff] }
  0x46   :  { %984 = vmatprep.subr.bf16.mxu0 %v983_v51  ;;  %v1003_v51 = vpack.c.bf16 %v171_v44, %v169_v40  ;;  %v84_v24 = vld [vmem:[%s1615_s0] sm:$0xff]  ;;  %v1049_v25 = vpack.c.bf16 %v579_v21, %v577_v20  ;;  %v87_v26 = vld [vmem:[%s1615_s0 + $0x18] sm:$0xff]  ;;  %v583_v29 = vld [vmem:[#allocation5 + $0x130] sm:$0xff] }
  0x47   :  { %v581_v28 = vld [vmem:[#allocation5 + $0x120] sm:$0xff]  ;;  %v586_v30 = vld [vmem:[#allocation5 + $0x148] sm:$0xff]  ;;  %v588_v31 = vld [vmem:[#allocation5 + $0x158] sm:$0xff] }
  0x48   :  { %1034 = vmatpush1.bf16.msra.mxu1 %v1033_v50  ;;  %v86_v32 = vld [vmem:[%s1615_s0 + $0x10] sm:$0xff]  ;;  %v1053_v33 = vpack.c.bf16 %v583_v29, %v581_v28  ;;  %v89_v34 = vld [vmem:[%s1615_s0 + $0x28] sm:$0xff]  ;;  %v585_v36 = vld [vmem:[#allocation5 + $0x140] sm:$0xff] }
  0x49   :  { %986 = vmatpush1.bf16.msra.mxu0 %v985_v58  ;;  %v572_v58 = vld [vmem:[#allocation5 + $0xd8] sm:$0xff]  ;;  %1036 = vmatprep.subr.bf16.mxu1 %v1035_v53  ;;  %v587_v37 = vld [vmem:[#allocation5 + $0x150] sm:$0xff]  ;;  %v88_v38 = vld [vmem:[%s1615_s0 + $0x20] sm:$0xff] }
  0x4a   :  { %988 = vmatprep.subr.bf16.mxu0 %v987_v0  ;;  %v177_v0 = vld [vmem:[#allocation3 + $0x1e8] sm:$0xff]  ;;  %v1039_v1 = vpack.c.bf16 %v572_v58, %v570_v57  ;;  %v91_v40 = vld [vmem:[%s1615_s0 + $0x38] sm:$0xff]  ;;  %v90_v41 = vld [vmem:[%s1615_s0 + $0x30] sm:$0xff] }
  0x4b   :  { %v1011_v10 = vpack.c.bf16 %v179_v4, %v177_v0  ;;  %v93_v42 = vld [vmem:[%s1615_s0 + $0x48] sm:$0xff]  ;;  %v92_v43 = vld [vmem:[%s1615_s0 + $0x40] sm:$0xff]  ;;  %v95_v44 = vld [vmem:[%s1615_s0 + $0x58] sm:$0xff] }
  0x4c   :  { %1038 = vmatpush1.bf16.msra.mxu1 %v1037_v62  ;;  %v94_v45 = vld [vmem:[%s1615_s0 + $0x50] sm:$0xff]  ;;  %v97_v46 = vld [vmem:[%s1615_s0 + $0x68] sm:$0xff]  ;;  %v99_v48 = vld [vmem:[%s1615_s0 + $0x78] sm:$0xff] }
  0x4d   :  { %990 = vmatpush1.bf16.msra.mxu0 %v989_v11  ;;  %v178_v11 = vld [vmem:[#allocation3 + $0x1f0] sm:$0xff]  ;;  %1040 = vmatprep.subr.bf16.mxu1 %v1039_v1  ;;  %v101_v50 = vld [vmem:[%s1615_s0 + $0x88] sm:$0xff]  ;;  %v103_v52 = vld [vmem:[%s1615_s0 + $0x98] sm:$0xff] }
  0x4e   :  { %992 = vmatprep.subr.bf16.mxu0 %v991_v15  ;;  %v578_v15 = vld [vmem:[#allocation5 + $0x108] sm:$0xff]  ;;  %v1013_v17 = vpack.c.bf16 %v178_v11, %v176_v8  ;;  %v98_v49 = vld [vmem:[%s1615_s0 + $0x70] sm:$0xff]  ;;  %v104_v55 = vld [vmem:[%s1615_s0 + $0xa0] sm:$0xff] }
  0x4f   :  { %v1047_v19 = vpack.c.bf16 %v580_v16, %v578_v15  ;;  %v102_v53 = vld [vmem:[%s1615_s0 + $0x90] sm:$0xff]  ;;  %v105_v54 = vld [vmem:[%s1615_s0 + $0xa8] sm:$0xff]  ;;  %v107_v56 = vld [vmem:[%s1615_s0 + $0xb8] sm:$0xff] }
  0x50   :  { %1042 = vmatpush1.bf16.msra.mxu1 %v1041_v9  ;;  %v106_v57 = vld [vmem:[%s1615_s0 + $0xb0] sm:$0xff]  ;;  %v109_v58 = vld [vmem:[%s1615_s0 + $0xc8] sm:$0xff]  ;;  %v111_v60 = vld [vmem:[%s1615_s0 + $0xd8] sm:$0xff] }
  0x51   :  { %994 = vmatpush1.bf16.msra.mxu0 %v993_v23  ;;  %1044 = vmatprep.subr.bf16.mxu1 %v1043_v12  ;;  %v584_v23 = vld [vmem:[#allocation5 + $0x138] sm:$0xff]  ;;  %v110_v61 = vld [vmem:[%s1615_s0 + $0xd0] sm:$0xff]  ;;  %v113_v62 = vld [vmem:[%s1615_s0 + $0xe8] sm:$0xff] }
  0x52   :  { %996 = vmatprep.subr.bf16.mxu0 %v995_v27  ;;  %v1051_v27 = vpack.c.bf16 %v584_v23, %v582_v22  ;;  %v115_v0 = vld [vmem:[%s1615_s0 + $0xf8] sm:$0xff]  ;;  %v114_v1 = vld [vmem:[%s1615_s0 + $0xf0] sm:$0xff]  ;;  %v590_v2 = vld [vmem:[#allocation5 + $0x168] sm:$0xff] }
  0x53   :  { %v592_v3 = vld [vmem:[#allocation5 + $0x178] sm:$0xff]  ;;  %v589_v5 = vld [vmem:[#allocation5 + $0x160] sm:$0xff]  ;;  %v591_v6 = vld [vmem:[#allocation5 + $0x170] sm:$0xff] }
  0x54   :  { %1046 = vmatpush1.bf16.msra.mxu1 %v1045_v18  ;;  %v1059_v4 = vpack.c.bf16 %v592_v3, %v590_v2  ;;  %v594_v8 = vld [vmem:[#allocation5 + $0x188] sm:$0xff]  ;;  %v596_v9 = vld [vmem:[#allocation5 + $0x198] sm:$0xff]  ;;  %v593_v11 = vld [vmem:[#allocation5 + $0x180] sm:$0xff] }
  0x55   :  { %998 = vmatpush1.bf16.msra.mxu0 %v997_v35  ;;  %1048 = vmatprep.subr.bf16.mxu1 %v1047_v19  ;;  %v1055_v35 = vpack.c.bf16 %v588_v31, %v586_v30  ;;  %v595_v12 = vld [vmem:[#allocation5 + $0x190] sm:$0xff]  ;;  %v598_v14 = vld [vmem:[#allocation5 + $0x1a8] sm:$0xff]  ;;  %v600_v15 = vld [vmem:[#allocation5 + $0x1b8] sm:$0xff] }
  0x56   :  { %1000 = vmatprep.subr.bf16.mxu0 %v999_v39  ;;  %v1057_v39 = vpack.c.bf16 %v587_v37, %v585_v36  ;;  %v1065_v13 = vpack.c.bf16 %v595_v12, %v593_v11  ;;  %v1067_v16 = vpack.c.bf16 %v600_v15, %v598_v14  ;;  %v599_v18 = vld [vmem:[#allocation5 + $0x1b0] sm:$0xff]  ;;  %v602_v20 = vld [vmem:[#allocation5 + $0x1c8] sm:$0xff]  ;;  %v604_v21 = vld [vmem:[#allocation5 + $0x1d8] sm:$0xff] }
  0x57   :  { %v1071_v22 = vpack.c.bf16 %v604_v21, %v602_v20  ;;  %v601_v23 = vld [vmem:[#allocation5 + $0x1c0] sm:$0xff]  ;;  %v607_v30 = vld [vmem:[#allocation5 + $0x1f0] sm:$0xff] }
  0x58   :  { %1050 = vmatpush1.bf16.msra.mxu1 %v1049_v25  ;;  %v605_v29 = vld [vmem:[#allocation5 + $0x1e0] sm:$0xff] }
  0x59   :  { %1002 = vmatpush1.bf16.msra.mxu0 %v1001_v47  ;;  %1052 = vmatprep.subr.bf16.mxu1 %v1051_v27  ;;  %v96_v47 = vld [vmem:[%s1615_s0 + $0x60] sm:$0xff]  ;;  %v608_v27 = vld [vmem:[#allocation5 + $0x1f8] sm:$0xff]  ;;  %v1077_v31 = vpack.c.bf16 %v607_v30, %v605_v29 }
  0x5a   :  { %1004 = vmatprep.subr.bf16.mxu0 %v1003_v51  ;;  %v100_v51 = vld [vmem:[%s1615_s0 + $0x80] sm:$0xff] }
  0x5c   :  { %1054 = vmatpush1.bf16.msra.mxu1 %v1053_v33 }
  0x5d   :  { %1006 = vmatpush1.bf16.msra.mxu0 %v1005_v59  ;;  %1056 = vmatprep.subr.bf16.mxu1 %v1055_v35  ;;  %v108_v59 = vld [vmem:[%s1615_s0 + $0xc0] sm:$0xff] }
  0x5e   :  { %1008 = vmatprep.subr.bf16.mxu0 %v1007_v63  ;;  %v112_v63 = vld [vmem:[%s1615_s0 + $0xe0] sm:$0xff] }
  0x5f   :  { %v180_v35 = vld [vmem:[%s1617_s2] sm:$0x3] }
  0x60   :  { %1058 = vmatpush1.bf16.msra.mxu1 %v1057_v39 }
  0x61   :  { %1010 = vmatpush1.bf16.msra.mxu0 %v1009_v7  ;;  %v1061_v7 = vpack.c.bf16 %v591_v6, %v589_v5  ;;  %1060 = vmatprep.subr.bf16.mxu1 %v1059_v4 }
  0x62   :  { %1012 = vmatprep.subr.bf16.mxu0 %v1011_v10  ;;  %v1063_v10 = vpack.c.bf16 %v596_v9, %v594_v8 }
  0x64   :  { %1062 = vmatpush1.bf16.msra.mxu1 %v1061_v7 }
  0x65   :  { %1014 = vmatpush1.bf16.msra.mxu0 %v1013_v17  ;;  %1064 = vmatprep.subr.bf16.mxu1 %v1063_v10  ;;  %v597_v17 = vld [vmem:[#allocation5 + $0x1a0] sm:$0xff] }
  0x66   :  { %v1069_v19 = vpack.c.bf16 %v599_v18, %v597_v17 }
  0x68   :  { %257 = vmatmul.mubr.f32.vlgmr.msra.gmra.mrb[0].mxu0 %v84_v24  ;;  %1066 = vmatpush1.bf16.msra.mxu1 %v1065_v13  ;;  %v603_v24 = vld [vmem:[#allocation5 + $0x1d0] sm:$0xff] }
  0x69   :  { %262 = vmatprep.mubr.f32.mxu0 %v87_v26  ;;  %1068 = vmatprep.subr.bf16.mxu1 %v1067_v16  ;;  %v1073_v25 = vpack.c.bf16 %v603_v24, %v601_v23  ;;  %v606_v26 = vld [vmem:[#allocation5 + $0x1e8] sm:$0xff] }
  0x6a   :  { %v1075_v28 = vpack.c.bf16 %v608_v27, %v606_v26 }
  0x6c   :  { %263 = vmatmul.mubr.f32.gmra.mrb[2].mxu0 %v86_v32  ;;  %1070 = vmatpush1.bf16.msra.mxu1 %v1069_v19  ;;  %v182_v32 = vlaneseq }
  0x6d   :  { %268 = vmatprep.mubr.f32.mxu0 %v89_v34  ;;  %1072 = vmatprep.subr.bf16.mxu1 %v1071_v22 }
  0x6e   :  { %v1349_v33 = vshrl.u32 %v182_v32, 7 }
  0x70   :  { %269 = vmatmul.mubr.f32.gmra.mrb[4].mxu0 %v88_v38  ;;  %1074 = vmatpush1.bf16.msra.mxu1 %v1073_v25  ;;  %v184_v34 = vsub.s32 0, %v1349_v33  ;;  %v188_v36 = vsub.s32 1, %v1349_v33 }
  0x71   :  { %274 = vmatprep.mubr.f32.mxu0 %v91_v40  ;;  %1076 = vmatprep.subr.bf16.mxu1 %v1075_v28 }
  0x72   :  { %v1358_v37 = vrot.slane %v180_v35, %v184_v34  ;;  %v1362_v38 = vrot.slane %v180_v35, %v188_v36 }
  0x74   :  { %275 = vmatmul.mubr.f32.gmra.mrb[6].mxu0 %v90_v41  ;;  %1078 = vmatpush1.bf16.msra.mxu1 %v1077_v31 }
  0x75   :  { %280 = vmatprep.mubr.f32.mxu0 %v93_v42 }
  0x78   :  { %281 = vmatmul.mubr.f32.gmra.mrb[8].mxu0 %v92_v43 }
  0x79   :  { %286 = vmatprep.mubr.f32.mxu0 %v95_v44 }
  0x7c   :  { %287 = vmatmul.mubr.f32.gmra.mrb[10].mxu0 %v94_v45 }
  0x7d   :  { %292 = vmatprep.mubr.f32.mxu0 %v97_v46 }
  0x80   :  { %293 = vmatmul.mubr.f32.gmra.mrb[12].mxu0 %v96_v47 }
  0x81   :  { %298 = vmatprep.mubr.f32.mxu0 %v99_v48 }
  0x84   :  { %299 = vmatmul.mubr.f32.gmra.mrb[14].mxu0 %v98_v49 }
  0x85   :  { %304 = vmatprep.mubr.f32.mxu0 %v101_v50 }
  0x88   :  { %305 = vmatmul.mubr.f32.gmra.mrb[16].mxu0 %v100_v51 }
  0x89   :  { %310 = vmatprep.mubr.f32.mxu0 %v103_v52 }
  0x8c   :  { %311 = vmatmul.mubr.f32.gmra.mrb[18].mxu0 %v102_v53 }
  0x8d   :  { %316 = vmatprep.mubr.f32.mxu0 %v105_v54 }
  0x90   :  { %317 = vmatmul.mubr.f32.gmra.mrb[20].mxu0 %v104_v55 }
  0x91   :  { %322 = vmatprep.mubr.f32.mxu0 %v107_v56 }
  0x94   :  { %323 = vmatmul.mubr.f32.gmra.mrb[22].mxu0 %v106_v57 }
  0x95   :  { %328 = vmatprep.mubr.f32.mxu0 %v109_v58 }
  0x98   :  { %329 = vmatmul.mubr.f32.gmra.mrb[24].mxu0 %v108_v59 }
  0x99   :  { %334 = vmatprep.mubr.f32.mxu0 %v111_v60 }
  0x9c   :  { %335 = vmatmul.mubr.f32.gmra.mrb[26].mxu0 %v110_v61 }
  0x9d   :  { %340 = vmatprep.mubr.f32.mxu0 %v113_v62 }
  0xa0   :  { %341 = vmatmul.mubr.f32.gmra.mrb[28].mxu0 %v112_v63 }
  0xa1   :  { %346 = vmatprep.mubr.f32.mxu0 %v115_v0 }
  0xa4   :  { %347 = vmatmul.mubr.f32.gmra.mrb[30].mxu0 %v114_v1 }
 0x13b   :  { %v258_v39 = vpop.f32.mrb[0].mxu0 }
 0x13c   :  { %v259_v40 = vadd.f32 %v258_v39, %v1358_v37  ;;  %v260_v41 = vpop.f32.mrb[1].mxu0 }
 0x13d   :  { %v261_v42 = vadd.f32 %v260_v41, %v1362_v38 }
 0x13e   :  { %v385_v43 = vmul.f32 0.70710677, %v259_v40  ;;  %v353_v7 = vmul.f32 0.5, %v259_v40 }
 0x13f   :  { %v386_v44 = vmul.f32 0.70710677, %v261_v42  ;;  %v264_v45 = vpop.f32.mrb[2].mxu0  ;;  %v354_v5 = vmul.f32 0.5, %v261_v42 }
 0x140   :  { %1083 = verf.f32 %v385_v43  ;;  %v265_v46 = vadd.f32 %v264_v45, %v1358_v37  ;;  %v266_v47 = vpop.f32.mrb[3].mxu0 }
 0x141   :  { %1085 = verf.f32 %v386_v44  ;;  %v267_v48 = vadd.f32 %v266_v47, %v1362_v38 }
 0x142   :  { %v387_v49 = vmul.f32 0.70710677, %v265_v46  ;;  %v355_v21 = vmul.f32 0.5, %v265_v46 }
 0x143   :  { %v388_v50 = vmul.f32 0.70710677, %v267_v48  ;;  %v270_v51 = vpop.f32.mrb[4].mxu0  ;;  %v356_v17 = vmul.f32 0.5, %v267_v48 }
 0x144   :  { %1087 = verf.f32 %v387_v49  ;;  %v271_v52 = vadd.f32 %v270_v51, %v1358_v37  ;;  %v272_v53 = vpop.f32.mrb[5].mxu0 }
 0x145   :  { %1089 = verf.f32 %v388_v50  ;;  %v273_v54 = vadd.f32 %v272_v53, %v1362_v38 }
 0x146   :  { %v389_v55 = vmul.f32 0.70710677, %v271_v52  ;;  %v357_v40 = vmul.f32 0.5, %v271_v52 }
 0x147   :  { %v390_v56 = vmul.f32 0.70710677, %v273_v54  ;;  %v276_v57 = vpop.f32.mrb[6].mxu0  ;;  %v358_v31 = vmul.f32 0.5, %v273_v54 }
 0x148   :  { %1091 = verf.f32 %v389_v55  ;;  %v1371_v58 = vadd.f32 %v276_v57, %v1358_v37  ;;  %v278_v59 = vpop.f32.mrb[7].mxu0 }
 0x149   :  { %1093 = verf.f32 %v390_v56  ;;  %v279_v60 = vadd.f32 %v278_v59, %v1362_v38 }
 0x14a   :  { %v1084_v61 = vpop.eup %1083  ;;  %v391_v62 = vmul.f32 0.70710677, %v1371_v58  ;;  %v359_v54 = vmul.f32 0.5, %v1371_v58 }
 0x14b   :  { %v1086_v63 = vpop.eup %1085  ;;  %v449_v0 = vadd.f32 1.0, %v1084_v61  ;;  %v392_v1 = vmul.f32 0.70710677, %v279_v60  ;;  %v282_v2 = vpop.f32.mrb[8].mxu0  ;;  %v360_v50 = vmul.f32 0.5, %v279_v60 }
 0x14c   :  { %1095 = verf.f32 %v391_v62  ;;  %v1376_v3 = vadd.f32 %v282_v2, %v1358_v37  ;;  %v284_v4 = vpop.f32.mrb[9].mxu0  ;;  %v450_v6 = vadd.f32 1.0, %v1086_v63 }
 0x14d   :  { %1097 = verf.f32 %v392_v1  ;;  %v1379_v8 = vadd.f32 %v284_v4, %v1362_v38  ;;  %v481_v16 = vmul.f32 %v449_v0, %v353_v7 }
 0x14e   :  { %v1088_v9 = vpop.eup %1087  ;;  %v393_v10 = vmul.f32 0.70710677, %v1376_v3  ;;  %v482_v11 = vmul.f32 %v450_v6, %v354_v5  ;;  %v361_v5 = vmul.f32 0.5, %v1376_v3 }
 0x14f   :  { %v1090_v12 = vpop.eup %1089  ;;  %v451_v13 = vadd.f32 1.0, %v1088_v9  ;;  %v394_v14 = vmul.f32 0.70710677, %v1379_v8  ;;  %v288_v15 = vpop.f32.mrb[10].mxu0  ;;  %v362_v1 = vmul.f32 0.5, %v1379_v8 }
 0x150   :  { %v452_v18 = vadd.f32 1.0, %v1090_v12  ;;  %1099 = verf.f32 %v393_v10  ;;  %v1384_v19 = vadd.f32 %v288_v15, %v1358_v37  ;;  %v290_v20 = vpop.f32.mrb[11].mxu0  ;;  %673 = vmatprep.mubr.f32.mxu1 %v482_v11 }
 0x151   :  { %1101 = verf.f32 %v394_v14  ;;  %v1387_v22 = vadd.f32 %v290_v20, %v1362_v38  ;;  %674 = vmatmul.mubr.f32.vlgmr.msra.gmra.mrb[0].mxu1 %v481_v16  ;;  %v483_v30 = vmul.f32 %v451_v13, %v355_v21 }
 0x152   :  { %v1092_v23 = vpop.eup %1091  ;;  %v395_v24 = vmul.f32 0.70710677, %v1384_v19  ;;  %v484_v25 = vmul.f32 %v452_v18, %v356_v17  ;;  %v363_v18 = vmul.f32 0.5, %v1384_v19 }
 0x153   :  { %v1094_v26 = vpop.eup %1093  ;;  %v453_v27 = vadd.f32 1.0, %v1092_v23  ;;  %v396_v28 = vmul.f32 0.70710677, %v1387_v22  ;;  %v294_v29 = vpop.f32.mrb[12].mxu0  ;;  %v364_v15 = vmul.f32 0.5, %v1387_v22 }
 0x154   :  { %v454_v32 = vadd.f32 1.0, %v1094_v26  ;;  %1103 = verf.f32 %v395_v24  ;;  %v1392_v35 = vadd.f32 %v294_v29, %v1358_v37  ;;  %v296_v39 = vpop.f32.mrb[13].mxu0  ;;  %679 = vmatprep.mubr.f32.mxu1 %v484_v25 }
 0x155   :  { %1105 = verf.f32 %v396_v28  ;;  %v1395_v41 = vadd.f32 %v296_v39, %v1362_v38  ;;  %680 = vmatmul.mubr.f32.gmra.mrb[2].mxu1 %v483_v30  ;;  %v485_v49 = vmul.f32 %v453_v27, %v357_v40 }
 0x156   :  { %v1096_v42 = vpop.eup %1095  ;;  %v397_v43 = vmul.f32 0.70710677, %v1392_v35  ;;  %v486_v44 = vmul.f32 %v454_v32, %v358_v31  ;;  %v365_v32 = vmul.f32 0.5, %v1392_v35 }
 0x157   :  { %v1098_v45 = vpop.eup %1097  ;;  %v455_v46 = vadd.f32 1.0, %v1096_v42  ;;  %v398_v47 = vmul.f32 0.70710677, %v1395_v41  ;;  %v300_v48 = vpop.f32.mrb[14].mxu0  ;;  %v366_v29 = vmul.f32 0.5, %v1395_v41 }
 0x158   :  { %v456_v51 = vadd.f32 1.0, %v1098_v45  ;;  %1107 = verf.f32 %v397_v43  ;;  %v1400_v52 = vadd.f32 %v300_v48, %v1358_v37  ;;  %v302_v53 = vpop.f32.mrb[15].mxu0  ;;  %685 = vmatprep.mubr.f32.mxu1 %v486_v44 }
 0x159   :  { %1109 = verf.f32 %v398_v47  ;;  %v1404_v55 = vadd.f32 %v302_v53, %v1362_v38  ;;  %686 = vmatmul.mubr.f32.gmra.mrb[4].mxu1 %v485_v49  ;;  %v487_v0 = vmul.f32 %v455_v46, %v359_v54 }
 0x15a   :  { %v1100_v56 = vpop.eup %1099  ;;  %v399_v57 = vmul.f32 0.70710677, %v1400_v52  ;;  %v488_v59 = vmul.f32 %v456_v51, %v360_v50  ;;  %v367_v51 = vmul.f32 0.5, %v1400_v52 }
 0x15b   :  { %v1102_v61 = vpop.eup %1101  ;;  %v457_v60 = vadd.f32 1.0, %v1100_v56  ;;  %v400_v62 = vmul.f32 0.70710677, %v1404_v55  ;;  %v306_v63 = vpop.f32.mrb[16].mxu0  ;;  %v368_v48 = vmul.f32 0.5, %v1404_v55 }
 0x15c   :  { %v458_v2 = vadd.f32 1.0, %v1102_v61  ;;  %1111 = verf.f32 %v399_v57  ;;  %v1410_v58 = vadd.f32 %v306_v63, %v1358_v37  ;;  %v308_v4 = vpop.f32.mrb[17].mxu0  ;;  %691 = vmatprep.mubr.f32.mxu1 %v488_v59 }
 0x15d   :  { %1113 = verf.f32 %v400_v62  ;;  %v1414_v6 = vadd.f32 %v308_v4, %v1362_v38  ;;  %692 = vmatmul.mubr.f32.gmra.mrb[6].mxu1 %v487_v0  ;;  %v489_v14 = vmul.f32 %v457_v60, %v361_v5 }
 0x15e   :  { %v1104_v7 = vpop.eup %1103  ;;  %v401_v9 = vmul.f32 0.70710677, %v1410_v58  ;;  %v490_v10 = vmul.f32 %v458_v2, %v362_v1  ;;  %v369_v2 = vmul.f32 0.5, %v1410_v58 }
 0x15f   :  { %v1106_v11 = vpop.eup %1105  ;;  %v459_v8 = vadd.f32 1.0, %v1104_v7  ;;  %v402_v12 = vmul.f32 0.70710677, %v1414_v6  ;;  %v312_v13 = vpop.f32.mrb[18].mxu0  ;;  %v370_v63 = vmul.f32 0.5, %v1414_v6 }
 0x160   :  { %v460_v16 = vadd.f32 1.0, %v1106_v11  ;;  %1115 = verf.f32 %v401_v9  ;;  %v1420_v3 = vadd.f32 %v312_v13, %v1358_v37  ;;  %v314_v17 = vpop.f32.mrb[19].mxu0  ;;  %697 = vmatprep.mubr.f32.mxu1 %v490_v10 }
 0x161   :  { %1117 = verf.f32 %v402_v12  ;;  %v1424_v20 = vadd.f32 %v314_v17, %v1362_v38  ;;  %698 = vmatmul.mubr.f32.gmra.mrb[8].mxu1 %v489_v14  ;;  %v491_v28 = vmul.f32 %v459_v8, %v363_v18 }
 0x162   :  { %v1108_v21 = vpop.eup %1107  ;;  %v403_v23 = vmul.f32 0.70710677, %v1420_v3  ;;  %v492_v24 = vmul.f32 %v460_v16, %v364_v15  ;;  %v371_v16 = vmul.f32 0.5, %v1420_v3 }
 0x163   :  { %v1110_v25 = vpop.eup %1109  ;;  %v461_v22 = vadd.f32 1.0, %v1108_v21  ;;  %v404_v26 = vmul.f32 0.70710677, %v1424_v20  ;;  %v318_v27 = vpop.f32.mrb[20].mxu0  ;;  %v372_v13 = vmul.f32 0.5, %v1424_v20 }
 0x164   :  { %v462_v30 = vadd.f32 1.0, %v1110_v25  ;;  %1119 = verf.f32 %v403_v23  ;;  %v1430_v19 = vadd.f32 %v318_v27, %v1358_v37  ;;  %v320_v31 = vpop.f32.mrb[21].mxu0  ;;  %703 = vmatprep.mubr.f32.mxu1 %v492_v24 }
 0x165   :  { %1121 = verf.f32 %v404_v26  ;;  %v1434_v39 = vadd.f32 %v320_v31, %v1362_v38  ;;  %704 = vmatmul.mubr.f32.gmra.mrb[10].mxu1 %v491_v28  ;;  %v493_v47 = vmul.f32 %v461_v22, %v365_v32 }
 0x166   :  { %v1112_v40 = vpop.eup %1111  ;;  %v405_v42 = vmul.f32 0.70710677, %v1430_v19  ;;  %v494_v43 = vmul.f32 %v462_v30, %v366_v29  ;;  %v373_v30 = vmul.f32 0.5, %v1430_v19 }
 0x167   :  { %v1114_v44 = vpop.eup %1113  ;;  %v463_v41 = vadd.f32 1.0, %v1112_v40  ;;  %v406_v45 = vmul.f32 0.70710677, %v1434_v39  ;;  %v324_v46 = vpop.f32.mrb[22].mxu0  ;;  %v374_v27 = vmul.f32 0.5, %v1434_v39 }
 0x168   :  { %v464_v49 = vadd.f32 1.0, %v1114_v44  ;;  %1123 = verf.f32 %v405_v42  ;;  %v1440_v35 = vadd.f32 %v324_v46, %v1358_v37  ;;  %v326_v50 = vpop.f32.mrb[23].mxu0  ;;  %709 = vmatprep.mubr.f32.mxu1 %v494_v43 }
 0x169   :  { %1125 = verf.f32 %v406_v45  ;;  %v1444_v53 = vadd.f32 %v326_v50, %v1362_v38  ;;  %710 = vmatmul.mubr.f32.gmra.mrb[12].mxu1 %v493_v47  ;;  %v495_v62 = vmul.f32 %v463_v41, %v367_v51 }
 0x16a   :  { %v1116_v54 = vpop.eup %1115  ;;  %v407_v56 = vmul.f32 0.70710677, %v1440_v35  ;;  %v496_v57 = vmul.f32 %v464_v49, %v368_v48  ;;  %v375_v19 = vmul.f32 0.5, %v1440_v35 }
 0x16b   :  { %v1118_v59 = vpop.eup %1117  ;;  %v465_v55 = vadd.f32 1.0, %v1116_v54  ;;  %v408_v61 = vmul.f32 0.70710677, %v1444_v53  ;;  %v330_v60 = vpop.f32.mrb[24].mxu0  ;;  %v376_v46 = vmul.f32 0.5, %v1444_v53 }
 0x16c   :  { %v466_v0 = vadd.f32 1.0, %v1118_v59  ;;  %1127 = verf.f32 %v407_v56  ;;  %v1450_v52 = vadd.f32 %v330_v60, %v1358_v37  ;;  %v332_v1 = vpop.f32.mrb[25].mxu0  ;;  %715 = vmatprep.mubr.f32.mxu1 %v496_v57 }
 0x16d   :  { %1129 = verf.f32 %v408_v61  ;;  %v1454_v4 = vadd.f32 %v332_v1, %v1362_v38  ;;  %716 = vmatmul.mubr.f32.gmra.mrb[14].mxu1 %v495_v62  ;;  %v497_v12 = vmul.f32 %v465_v55, %v369_v2 }
 0x16e   :  { %v1120_v5 = vpop.eup %1119  ;;  %v409_v7 = vmul.f32 0.70710677, %v1450_v52  ;;  %v498_v9 = vmul.f32 %v466_v0, %v370_v63 }
 0x16f   :  { %v1122_v10 = vpop.eup %1121  ;;  %v467_v6 = vadd.f32 1.0, %v1120_v5  ;;  %v410_v11 = vmul.f32 0.70710677, %v1454_v4  ;;  %v336_v8 = vpop.f32.mrb[26].mxu0  ;;  %v378_v53 = vmul.f32 0.5, %v1454_v4 }
 0x170   :  { %v468_v14 = vadd.f32 1.0, %v1122_v10  ;;  %1131 = verf.f32 %v409_v7  ;;  %v1460_v58 = vadd.f32 %v336_v8, %v1358_v37  ;;  %v338_v15 = vpop.f32.mrb[27].mxu0  ;;  %721 = vmatprep.mubr.f32.mxu1 %v498_v9 }
 0x171   :  { %1133 = verf.f32 %v410_v11  ;;  %v339_v17 = vadd.f32 %v338_v15, %v1362_v38  ;;  %722 = vmatmul.mubr.f32.gmra.mrb[16].mxu1 %v497_v12  ;;  %v499_v26 = vmul.f32 %v467_v6, %v371_v16 }
 0x172   :  { %v1124_v18 = vpop.eup %1123  ;;  %v411_v21 = vmul.f32 0.70710677, %v1460_v58  ;;  %v500_v23 = vmul.f32 %v468_v14, %v372_v13  ;;  %v379_v5 = vmul.f32 0.5, %v1460_v58 }
 0x173   :  { %v1126_v24 = vpop.eup %1125  ;;  %v469_v25 = vadd.f32 1.0, %v1124_v18  ;;  %v412_v20 = vmul.f32 0.70710677, %v339_v17  ;;  %v342_v22 = vpop.f32.mrb[28].mxu0  ;;  %v380_v1 = vmul.f32 0.5, %v339_v17 }
 0x174   :  { %v470_v28 = vadd.f32 1.0, %v1126_v24  ;;  %1135 = verf.f32 %v411_v21  ;;  %v343_v29 = vadd.f32 %v342_v22, %v1358_v37  ;;  %v344_v3 = vpop.f32.mrb[29].mxu0  ;;  %727 = vmatprep.mubr.f32.mxu1 %v500_v23  ;;  %v869_v24 = vld [vmem:[%s1619_s4] sm:$0x3] }
 0x175   :  { %1137 = verf.f32 %v412_v20  ;;  %v345_v31 = vadd.f32 %v344_v3, %v1362_v38  ;;  %728 = vmatmul.mubr.f32.gmra.mrb[18].mxu1 %v499_v26  ;;  %v501_v39 = vmul.f32 %v469_v25, %v373_v30  ;;  %v1481_v25 = vrot.slane %v869_v24, %v184_v34 }
 0x176   :  { %v1128_v32 = vpop.eup %1127  ;;  %v413_v40 = vmul.f32 0.70710677, %v343_v29  ;;  %v502_v42 = vmul.f32 %v470_v28, %v374_v27  ;;  %v381_v8 = vmul.f32 0.5, %v343_v29  ;;  %v1485_v20 = vrot.slane %v869_v24, %v188_v36 }
 0x177   :  { %v1130_v43 = vpop.eup %1129  ;;  %v471_v44 = vadd.f32 1.0, %v1128_v32  ;;  %v414_v41 = vmul.f32 0.70710677, %v345_v31  ;;  %v348_v45 = vpop.f32.mrb[30].mxu0  ;;  %v382_v11 = vmul.f32 0.5, %v345_v31 }
 0x178   :  { %v472_v47 = vadd.f32 1.0, %v1130_v43  ;;  %1139 = verf.f32 %v413_v40  ;;  %v349_v48 = vadd.f32 %v348_v45, %v1358_v37  ;;  %v350_v49 = vpop.f32.mrb[31].mxu0  ;;  %733 = vmatprep.mubr.f32.mxu1 %v502_v42  ;;  %v377_v37 = vmul.f32 0.5, %v1450_v52 }
 0x179   :  { %1141 = verf.f32 %v414_v41  ;;  %v351_v50 = vadd.f32 %v350_v49, %v1362_v38  ;;  %734 = vmatmul.mubr.f32.gmra.mrb[20].mxu1 %v501_v39  ;;  %v503_v61 = vmul.f32 %v471_v44, %v375_v19 }
 0x17a   :  { %v1132_v51 = vpop.eup %1131  ;;  %v415_v54 = vmul.f32 0.70710677, %v349_v48  ;;  %v504_v56 = vmul.f32 %v472_v47, %v376_v46  ;;  %v383_v58 = vmul.f32 0.5, %v349_v48 }
 0x17b   :  { %v1134_v57 = vpop.eup %1133  ;;  %v473_v59 = vadd.f32 1.0, %v1132_v51  ;;  %v416_v55 = vmul.f32 0.70710677, %v351_v50  ;;  %v384_v17 = vmul.f32 0.5, %v351_v50 }
 0x17c   :  { %v474_v60 = vadd.f32 1.0, %v1134_v57  ;;  %1143 = verf.f32 %v415_v54  ;;  %739 = vmatprep.mubr.f32.mxu1 %v504_v56 }
 0x17d   :  { %1145 = verf.f32 %v416_v55  ;;  %740 = vmatmul.mubr.f32.gmra.mrb[22].mxu1 %v503_v61  ;;  %v505_v0 = vmul.f32 %v473_v59, %v377_v37 }
 0x17e   :  { %v1136_v35 = vpop.eup %1135  ;;  %v506_v62 = vmul.f32 %v474_v60, %v378_v53 }
 0x17f   :  { %v1138_v38 = vpop.eup %1137  ;;  %v475_v63 = vadd.f32 1.0, %v1136_v35 }
 0x180   :  { %v476_v2 = vadd.f32 1.0, %v1138_v38  ;;  %745 = vmatprep.mubr.f32.mxu1 %v506_v62 }
 0x181   :  { %746 = vmatmul.mubr.f32.gmra.mrb[24].mxu1 %v505_v0  ;;  %v507_v6 = vmul.f32 %v475_v63, %v379_v5 }
 0x182   :  { %v1140_v7 = vpop.eup %1139  ;;  %v508_v4 = vmul.f32 %v476_v2, %v380_v1 }
 0x183   :  { %v1142_v9 = vpop.eup %1141  ;;  %v477_v10 = vadd.f32 1.0, %v1140_v7 }
 0x184   :  { %v478_v52 = vadd.f32 1.0, %v1142_v9  ;;  %751 = vmatprep.mubr.f32.mxu1 %v508_v4 }
 0x185   :  { %752 = vmatmul.mubr.f32.gmra.mrb[26].mxu1 %v507_v6  ;;  %v509_v16 = vmul.f32 %v477_v10, %v381_v8 }
 0x186   :  { %v1144_v12 = vpop.eup %1143  ;;  %v510_v13 = vmul.f32 %v478_v52, %v382_v11 }
 0x187   :  { %v1146_v14 = vpop.eup %1145  ;;  %v479_v15 = vadd.f32 1.0, %v1144_v12 }
 0x188   :  { %v480_v18 = vadd.f32 1.0, %v1146_v14  ;;  %757 = vmatprep.mubr.f32.mxu1 %v510_v13 }
 0x189   :  { %758 = vmatmul.mubr.f32.gmra.mrb[28].mxu1 %v509_v16  ;;  %v511_v23 = vmul.f32 %v479_v15, %v383_v58 }
 0x18a   :  { %v512_v21 = vmul.f32 %v480_v18, %v384_v17 }
 0x18c   :  { %763 = vmatprep.mubr.f32.mxu1 %v512_v21 }
 0x18d   :  { %764 = vmatmul.mubr.f32.gmra.mrb[30].mxu1 %v511_v23 }
 0x224   :  { %v675_v22 = vpop.f32.mrb[0].mxu1 }
 0x225   :  { %v881_v26 = vadd.f32 %v1481_v25, %v675_v22  ;;  %v677_v27 = vpop.f32.mrb[1].mxu1 }
 0x226   :  { %v882_v28 = vadd.f32 %v1485_v20, %v677_v27 }
 0x227   :  { %913 = vst [vmem:[%s1620_s5] sm:$0xff] %v881_v26 }
 0x228   :  { %914 = vst [vmem:[%s1620_s5 + $0x8] sm:$0xff] %v882_v28  ;;  %v681_v34 = vpop.f32.mrb[2].mxu1 }
 0x229   :  { %v883_v29 = vadd.f32 %v1481_v25, %v681_v34  ;;  %v683_v33 = vpop.f32.mrb[3].mxu1 }
 0x22a   :  { %v884_v36 = vadd.f32 %v1485_v20, %v683_v33 }
 0x22b   :  { %915 = vst [vmem:[%s1620_s5 + $0x10] sm:$0xff] %v883_v29 }
 0x22c   :  { %916 = vst [vmem:[%s1620_s5 + $0x18] sm:$0xff] %v884_v36  ;;  %v687_v3 = vpop.f32.mrb[4].mxu1 }
 0x22d   :  { %v885_v30 = vadd.f32 %v1481_v25, %v687_v3  ;;  %v689_v31 = vpop.f32.mrb[5].mxu1 }
 0x22e   :  { %v886_v32 = vadd.f32 %v1485_v20, %v689_v31 }
 0x22f   :  { %917 = vst [vmem:[%s1620_s5 + $0x20] sm:$0xff] %v885_v30 }
 0x230   :  { %918 = vst [vmem:[%s1620_s5 + $0x28] sm:$0xff] %v886_v32  ;;  %v693_v40 = vpop.f32.mrb[6].mxu1 }
 0x231   :  { %v887_v42 = vadd.f32 %v1481_v25, %v693_v40  ;;  %v695_v43 = vpop.f32.mrb[7].mxu1 }
 0x232   :  { %v888_v44 = vadd.f32 %v1485_v20, %v695_v43 }
 0x233   :  { %919 = vst [vmem:[%s1620_s5 + $0x30] sm:$0xff] %v887_v42 }
 0x234   :  { %920 = vst [vmem:[%s1620_s5 + $0x38] sm:$0xff] %v888_v44  ;;  %v699_v41 = vpop.f32.mrb[8].mxu1 }
 0x235   :  { %v889_v45 = vadd.f32 %v1481_v25, %v699_v41  ;;  %v701_v39 = vpop.f32.mrb[9].mxu1 }
 0x236   :  { %v890_v46 = vadd.f32 %v1485_v20, %v701_v39 }
 0x237   :  { %921 = vst [vmem:[%s1620_s5 + $0x40] sm:$0xff] %v889_v45 }
 0x238   :  { %922 = vst [vmem:[%s1620_s5 + $0x48] sm:$0xff] %v890_v46  ;;  %v705_v47 = vpop.f32.mrb[10].mxu1 }
 0x239   :  { %v891_v48 = vadd.f32 %v1481_v25, %v705_v47  ;;  %v707_v49 = vpop.f32.mrb[11].mxu1 }
 0x23a   :  { %v892_v19 = vadd.f32 %v1485_v20, %v707_v49 }
 0x23b   :  { %923 = vst [vmem:[%s1620_s5 + $0x50] sm:$0xff] %v891_v48 }
 0x23c   :  { %924 = vst [vmem:[%s1620_s5 + $0x58] sm:$0xff] %v892_v19  ;;  %v711_v50 = vpop.f32.mrb[12].mxu1 }
 0x23d   :  { %v893_v51 = vadd.f32 %v1481_v25, %v711_v50  ;;  %v713_v54 = vpop.f32.mrb[13].mxu1 }
 0x23e   :  { %v894_v56 = vadd.f32 %v1485_v20, %v713_v54 }
 0x23f   :  { %925 = vst [vmem:[%s1620_s5 + $0x60] sm:$0xff] %v893_v51 }
 0x240   :  { %926 = vst [vmem:[%s1620_s5 + $0x68] sm:$0xff] %v894_v56  ;;  %v717_v57 = vpop.f32.mrb[14].mxu1 }
 0x241   :  { %v895_v59 = vadd.f32 %v1481_v25, %v717_v57  ;;  %v719_v55 = vpop.f32.mrb[15].mxu1 }
 0x242   :  { %v896_v61 = vadd.f32 %v1485_v20, %v719_v55 }
 0x243   :  { %927 = vst [vmem:[%s1620_s5 + $0x70] sm:$0xff] %v895_v59 }
 0x244   :  { %928 = vst [vmem:[%s1620_s5 + $0x78] sm:$0xff] %v896_v61  ;;  %v723_v53 = vpop.f32.mrb[16].mxu1 }
 0x245   :  { %v897_v60 = vadd.f32 %v1481_v25, %v723_v53  ;;  %v725_v37 = vpop.f32.mrb[17].mxu1 }
 0x246   :  { %v898_v35 = vadd.f32 %v1485_v20, %v725_v37 }
 0x247   :  { %929 = vst [vmem:[%s1620_s5 + $0x80] sm:$0xff] %v897_v60 }
 0x248   :  { %930 = vst [vmem:[%s1620_s5 + $0x88] sm:$0xff] %v898_v35  ;;  %v729_v62 = vpop.f32.mrb[18].mxu1 }
 0x249   :  { %v899_v38 = vadd.f32 %v1481_v25, %v729_v62  ;;  %v731_v63 = vpop.f32.mrb[19].mxu1 }
 0x24a   :  { %v900_v0 = vadd.f32 %v1485_v20, %v731_v63 }
 0x24b   :  { %931 = vst [vmem:[%s1620_s5 + $0x90] sm:$0xff] %v899_v38 }
 0x24c   :  { %932 = vst [vmem:[%s1620_s5 + $0x98] sm:$0xff] %v900_v0  ;;  %v735_v1 = vpop.f32.mrb[20].mxu1 }
 0x24d   :  { %v901_v2 = vadd.f32 %v1481_v25, %v735_v1  ;;  %v737_v5 = vpop.f32.mrb[21].mxu1 }
 0x24e   :  { %v902_v7 = vadd.f32 %v1485_v20, %v737_v5 }
 0x24f   :  { %933 = vst [vmem:[%s1620_s5 + $0xa0] sm:$0xff] %v901_v2 }
 0x250   :  { %934 = vst [vmem:[%s1620_s5 + $0xa8] sm:$0xff] %v902_v7  ;;  %v741_v4 = vpop.f32.mrb[22].mxu1 }
 0x251   :  { %v903_v9 = vadd.f32 %v1481_v25, %v741_v4  ;;  %v743_v10 = vpop.f32.mrb[23].mxu1 }
 0x252   :  { %v904_v6 = vadd.f32 %v1485_v20, %v743_v10 }
 0x253   :  { %935 = vst [vmem:[%s1620_s5 + $0xb0] sm:$0xff] %v903_v9 }
 0x254   :  { %936 = vst [vmem:[%s1620_s5 + $0xb8] sm:$0xff] %v904_v6  ;;  %v747_v11 = vpop.f32.mrb[24].mxu1 }
 0x255   :  { %v905_v52 = vadd.f32 %v1481_v25, %v747_v11  ;;  %v749_v8 = vpop.f32.mrb[25].mxu1 }
 0x256   :  { %v906_v12 = vadd.f32 %v1485_v20, %v749_v8 }
 0x257   :  { %937 = vst [vmem:[%s1620_s5 + $0xc0] sm:$0xff] %v905_v52 }
 0x258   :  { %938 = vst [vmem:[%s1620_s5 + $0xc8] sm:$0xff] %v906_v12  ;;  %v753_v13 = vpop.f32.mrb[26].mxu1 }
 0x259   :  { %v907_v14 = vadd.f32 %v1481_v25, %v753_v13  ;;  %v755_v15 = vpop.f32.mrb[27].mxu1 }
 0x25a   :  { %v908_v16 = vadd.f32 %v1485_v20, %v755_v15 }
 0x25b   :  { %939 = vst [vmem:[%s1620_s5 + $0xd0] sm:$0xff] %v907_v14 }
 0x25c   :  { %940 = vst [vmem:[%s1620_s5 + $0xd8] sm:$0xff] %v908_v16  ;;  %v759_v17 = vpop.f32.mrb[28].mxu1 }
 0x25d   :  { %v909_v18 = vadd.f32 %v1481_v25, %v759_v17  ;;  %v761_v58 = vpop.f32.mrb[29].mxu1 }
 0x25e   :  { %v910_v21 = vadd.f32 %v1485_v20, %v761_v58 }
 0x25f   :  { %941 = vst [vmem:[%s1620_s5 + $0xe0] sm:$0xff] %v909_v18 }
 0x260   :  { %942 = vst [vmem:[%s1620_s5 + $0xe8] sm:$0xff] %v910_v21  ;;  %v765_v23 = vpop.f32.mrb[30].mxu1 }
 0x261   :  { %v911_v24 = vadd.f32 %v1481_v25, %v765_v23  ;;  %v767_v22 = vpop.f32.mrb[31].mxu1 }
 0x262   :  { %v912_v26 = vadd.f32 %v1485_v20, %v767_v22 }
 0x263   :  { %943 = vst [vmem:[%s1620_s5 + $0xf0] sm:$0xff] %v911_v24 }
 0x264   :  { %944 = vst [vmem:[%s1620_s5 + $0xf8] sm:$0xff] %v912_v26 }
 0x265   :  { %949 = vsyncpa [#allocation4], 1 }
 0x266   :  { %950 = vsyncpa [#allocation6], 1 }

</bundles_post_ra>
